<compile_context>
chip_gen: v7x
topology: tpu7x:2x2x1
jax: 0.10.0
libtpu: 0.0.40
codegen_flags: <defaults>
</compile_context>

<pallas_src>
import functools

import numpy as np
import jax
import jax.numpy as jnp
from jax.experimental import pallas as pl
from jax.experimental.pallas import tpu as pltpu


def _round_up(x, m):
    return ((x + m - 1) // m) * m


# ---------------------------------------------------------------------------
# Pallas kernel: one grid step processes a (Nb, C, HW_pad) block of the batch.
#   * in-kernel bilinear mask resize (one MXU dot against R)
#   * masked feature map + max pools in packed bf16 (VPU)
#   * avg pools via one batched MXU einsum (sum reductions off the VPU)
#   * 4-branch 1x1-conv MLP + final block, batched across the block (2 MXU dots)
#   * blend  out = fm + cw*(mfm - fm)  in bf16
# ---------------------------------------------------------------------------
def masked_attention_kernel(fm_ref, mk_ref, r_ref, wct_ref, bc_ref, wft_ref,
                            bfb_ref, out_ref, *, hw):
    nb, c, hw_pad = fm_ref.shape
    cr = wft_ref.shape[0]
    f32, bf16 = jnp.float32, jnp.bfloat16
    inv_hw = jnp.float32(1.0 / hw)

    fm = fm_ref[...]                                          # (nb, c, hwp) bf16

    # ---- bilinear mask resize (align_corners=False), one MXU dot -----------
    mk_small = mk_ref[...][:, 0, :]                           # (nb, Hm*Wm) f32
    mk = jnp.dot(mk_small, r_ref[...],
                 preferred_element_type=f32)                  # (nb, hwp) f32
    mk_bf = mk.astype(bf16)

    # ---- masked feature map (pooling temp / blend input), bf16 VPU ---------
    mfm = fm * mk_bf[:, None, :]                              # (nb, c, hwp) bf16

    # ---- global max pools (padded lanes masked with -inf) ------------------
    if hw_pad > hw:
        lane = jax.lax.broadcasted_iota(jnp.int32, (1, 1, hw_pad), 2)
        neg = jnp.where(lane < hw, 0.0, -jnp.inf).astype(bf16)
        valid = jnp.where(lane < hw, 1.0, 0.0).astype(bf16)   # (1, 1, hwp)
        max_fm = jnp.max(fm + neg, axis=-1).astype(f32)       # (nb, c)
        max_mfm = jnp.max(mfm + neg, axis=-1).astype(f32)
    else:
        valid = jnp.ones((1, 1, hw_pad), bf16)
        max_fm = jnp.max(fm, axis=-1).astype(f32)
        max_mfm = jnp.max(mfm, axis=-1).astype(f32)

    # ---- global avg pools on the MXU (one batched dot, f32 accumulation) ---
    pool_t = jnp.concatenate(
        [jnp.broadcast_to(valid, (nb, 1, hw_pad)), mk_bf[:, None, :]], axis=1)
    sums = jnp.einsum('nch,nkh->nck', fm, pool_t,
                      preferred_element_type=f32)             # (nb, c, 2)
    avg_fm = sums[:, :, 0] * inv_hw                           # (nb, c) f32
    avg_mfm = sums[:, :, 1] * inv_hw

    # ---- 4-branch 1x1 Conv + folded BN + LeakyReLU, batched across block ---
    # Branch order matches the PyTorch module:
    #   conv0(avg_fm) + conv1(max_fm) + conv2(max_mfm) + conv3(avg_mfm)
    x = jnp.concatenate([avg_fm, max_fm, max_mfm, avg_mfm], axis=0)   # (4nb, c)
    y = jnp.dot(x.astype(bf16), wct_ref[...],
                preferred_element_type=f32) + bc_ref[...]             # (4nb, 4cr)
    y = jnp.where(y > 0, y, 0.2 * y)                                  # LeakyReLU(0.2)
    s = (y[0 * nb:1 * nb, 0 * cr:1 * cr] + y[1 * nb:2 * nb, 1 * cr:2 * cr]
         + y[2 * nb:3 * nb, 2 * cr:3 * cr] + y[3 * nb:4 * nb, 3 * cr:4 * cr])

    # ---- final block: 1x1 Conv + folded BN + Sigmoid (+ Dropout = id) ------
    z = jnp.dot(s.astype(bf16), wft_ref[...],
                preferred_element_type=f32) + bfb_ref[...]            # (nb, c)
    cw = jax.nn.sigmoid(z).astype(bf16)                               # (nb, c)

    # ---- blend: cw*mfm + (1-cw)*fm == fm + cw*(mfm - fm), bf16 epilogue ----
    out_ref[...] = fm + cw[:, :, None] * (mfm - fm)


# ---------------------------------------------------------------------------
# JAX glue
# ---------------------------------------------------------------------------
def _resize_matrix(out_size, in_size):
    """Separable bilinear-resize matrix, PyTorch align_corners=False."""
    i = jnp.arange(out_size, dtype=jnp.float32)
    scale = in_size / out_size
    src = jnp.maximum((i + 0.5) * scale - 0.5, 0.0)
    i0 = jnp.minimum(jnp.floor(src).astype(jnp.int32), in_size - 1)
    i1 = jnp.minimum(i0 + 1, in_size - 1)
    w1 = src - i0.astype(jnp.float32)
    w0 = 1.0 - w1
    oh0 = jax.nn.one_hot(i0, in_size, dtype=jnp.float32)
    oh1 = jax.nn.one_hot(i1, in_size, dtype=jnp.float32)
    return w0[:, None] * oh0 + w1[:, None] * oh1       # (out_size, in_size)


def _fold_bn(w, b, gamma, beta, mean, var, eps=1e-5):
    """Fold BatchNorm (eval mode) into a 1x1 conv: y = W'x + b'."""
    scale = gamma / jnp.sqrt(var + eps)
    return scale[:, None] * w, scale * (b - mean) + beta


def init_params(key, in_channels, r=1):
    C = in_channels
    Cr = int(C * r)
    keys = jax.random.split(key, 10)
    ws, bs = [], []
    # 4 branch blocks: Conv2d(C, Cr, 1) + BN(Cr) + LeakyReLU(0.2)
    for i in range(4):
        w = jax.random.normal(keys[2 * i], (Cr, C), jnp.float32) * 0.1
        b = jax.random.normal(keys[2 * i + 1], (Cr,), jnp.float32) * 0.1
        gamma = jnp.ones((Cr,), jnp.float32) + 0.05 * (i + 1)
        beta = jnp.full((Cr,), 0.01 * (i + 1), jnp.float32)
        mean = jnp.zeros((Cr,), jnp.float32)    # default running stats
        var = jnp.ones((Cr,), jnp.float32)
        we, be = _fold_bn(w, b, gamma, beta, mean, var)
        ws.append(we)
        bs.append(be)
    params = {
        "wcat": jnp.concatenate(ws, axis=0),           # (4*Cr, C)
        "bcat": jnp.concatenate(bs, axis=0)[:, None],  # (4*Cr, 1)
    }
    # final block: Conv2d(Cr, C, 1) + BN(C) + Sigmoid + Dropout(eval=identity)
    wf = jax.random.normal(keys[8], (C, Cr), jnp.float32) * 0.1
    bf = jax.random.normal(keys[9], (C,), jnp.float32) * 0.1
    gamma = jnp.ones((C,), jnp.float32) * 1.1
    beta = jnp.full((C,), 0.02, jnp.float32)
    mean = jnp.zeros((C,), jnp.float32)
    var = jnp.ones((C,), jnp.float32)
    wfe, bfe = _fold_bn(wf, bf, gamma, beta, mean, var)
    params["wf"] = wfe                                  # (C, Cr)
    params["bf"] = bfe[:, None]                         # (C, 1)
    return params


def resize_mask(mask, H, W):
    # mask: (N, 1, Hm, Wm) -> (N, 1, H, W), bilinear align_corners=False
    Rh = _resize_matrix(H, mask.shape[2])
    Rw = _resize_matrix(W, mask.shape[3])
    return jnp.einsum("hH,ncHW,wW->nchw", Rh, mask, Rw)


def _tpu_vmem_bytes():
    try:
        info = pltpu.get_tpu_info()
        v = getattr(info, "vmem_capacity_bytes", None)
        if v:
            return int(v)
    except Exception:
        pass
    return None


def masked_attention(feature_map, mask, params, *, block_bytes=None):
    N, C, H, W = feature_map.shape
    Cr = params["wf"].shape[1]
    Hm, Wm = int(mask.shape[2]), int(mask.shape[3])
    HW, HmWm = H * W, Hm * Wm
    HW_pad = _round_up(HW, 128)                         # lane-dense (x128)

    # Generation-aware block-size target and VMEM cap.
    vmem_phys = _tpu_vmem_bytes()
    if block_bytes is None:
        block_bytes = (8 << 20) if (vmem_phys or 0) >= (100 << 20) else (4 << 20)
    vmem_cap = (vmem_phys * 7 // 8) if vmem_phys else (48 << 20)

    # Combined separable bilinear-resize matrix (PyTorch align_corners=False):
    #   resized[n, h*W+w] = sum_{H',W'} mask[n, H'*Wm+W'] * R[H'*Wm+W', h*W+w]
    # TODO(synk): for very large Hm*Wm x H*W replace this kron'd matrix with a
    # two-sided separable resize (two small dots) to bound its footprint.
    Rh = _resize_matrix(H, Hm)
    Rw = _resize_matrix(W, Wm)
    R = jnp.einsum("hH,wW->HWhw", Rh, Rw).reshape(HmWm, HW).astype(jnp.float32)
    if HW_pad != HW:
        R = jnp.pad(R, ((0, 0), (0, HW_pad - HW)))

    fm = feature_map.reshape(N, C, HW).astype(jnp.bfloat16)     # bf16 HBM I/O
    if HW_pad != HW:
        fm = jnp.pad(fm, ((0, 0), (0, 0), (0, HW_pad - HW)))
    mk = mask.reshape(N, 1, HmWm).astype(jnp.float32)           # tiny raw mask

    # Batch-block size: target ~block_bytes of (sublane-padded) bf16 feature
    # map per grid step, but keep >= ~8 grid steps when N allows so BlockSpec
    # double-buffering can hide the prologue/epilogue DMAs on both cores.
    C_pad = _round_up(C, 16)                                    # bf16 sublane tile
    per_elem = C_pad * HW_pad * 2
    Nb = max(1, min(N, block_bytes // max(per_elem, 1)))
    if N >= 2:
        Nb = min(Nb, max(1, pl.cdiv(N, 8)))
    n_blocks = pl.cdiv(N, Nb)
    N_pad = n_blocks * Nb
    if N_pad != N:
        fm = jnp.pad(fm, ((0, N_pad - N), (0, 0), (0, 0)))
        mk = jnp.pad(mk, ((0, N_pad - N), (0, 0), (0, 0)))

    # Transposed bf16 weights so the batched in-kernel dots produce
    # (rows = batch, lanes = channels) outputs directly; biases stay f32.
    wcat_t = params["wcat"].T.astype(jnp.bfloat16)              # (C, 4*Cr)
    bcat_r = params["bcat"].reshape(1, 4 * Cr).astype(jnp.float32)
    wf_t = params["wf"].T.astype(jnp.bfloat16)                  # (Cr, C)
    bf_r = params["bf"].reshape(1, C).astype(jnp.float32)

    # VMEM budget: double-buffered fm in/out blocks + mask/R/weights + the
    # vectorized block temporaries (mfm, blend temp, resized mask, pool rows).
    fm_blk = Nb * C_pad * HW_pad * 2
    msk_blk = Nb * 8 * HmWm * 4
    fixed = HmWm * HW_pad * 4 + (C * 4 * Cr + 4 * Cr + Cr * C + C) * 4
    temps = 3 * fm_blk + Nb * HW_pad * 64
    est = 2 * (2 * fm_blk) + 2 * msk_blk + 2 * fixed + temps + (2 << 20)
    vmem_limit = int(min(vmem_cap, max(32 << 20, est)))

    kernel = functools.partial(masked_attention_kernel, hw=HW)

    out = pl.pallas_call(
        kernel,
        out_shape=jax.ShapeDtypeStruct((N_pad, C, HW_pad), jnp.bfloat16),
        grid_spec=pltpu.PrefetchScalarGridSpec(
            num_scalar_prefetch=0,
            grid=(n_blocks,),
            in_specs=[
                pl.BlockSpec((Nb, C, HW_pad), lambda n: (n, 0, 0)),   # feature map
                pl.BlockSpec((Nb, 1, HmWm), lambda n: (n, 0, 0)),     # raw mask
                pl.BlockSpec((HmWm, HW_pad), lambda n: (0, 0)),       # resize matrix
                pl.BlockSpec((C, 4 * Cr), lambda n: (0, 0)),          # branch W^T
                pl.BlockSpec((1, 4 * Cr), lambda n: (0, 0)),          # branch bias
                pl.BlockSpec((Cr, C), lambda n: (0, 0)),              # final W^T
                pl.BlockSpec((1, C), lambda n: (0, 0)),               # final bias
            ],
            out_specs=pl.BlockSpec((Nb, C, HW_pad), lambda n: (n, 0, 0)),
        ),
        compiler_params=pltpu.CompilerParams(
            dimension_semantics=("parallel",),
            vmem_limit_bytes=vmem_limit),
    )(fm, mk, R, wcat_t, bcat_r, wf_t, bf_r)

    return out[:N, :, :HW].reshape(N, C, H, W)                  # bf16


# ---------------------------------------------------------------------------
# Pure-JAX reference (mirrors the PyTorch forward, eval mode)
# ---------------------------------------------------------------------------
def masked_attention_ref(feature_map, mask, params):
    N, C, H, W = feature_map.shape
    Cr = params["wf"].shape[1]
    wb = params["wcat"].reshape(4, Cr, C)
    bb = params["bcat"].reshape(4, Cr)
    mk = resize_mask(mask, H, W)
    mfm = feature_map * mk
    avg_fm = feature_map.mean(axis=(2, 3))
    max_fm = feature_map.max(axis=(2, 3))
    avg_mfm = mfm.mean(axis=(2, 3))
    max_mfm = mfm.max(axis=(2, 3))

    def branch(i, x):  # x: (N, C)
        y = x @ wb[i].T + bb[i]
        return jnp.where(y > 0, y, 0.2 * y)

    s = (branch(0, avg_fm) + branch(1, max_fm)
         + branch(2, max_mfm) + branch(3, avg_mfm))
    cw = jax.nn.sigmoid(s @ params["wf"].T + params["bf"][:, 0])   # (N, C)
    cw = cw[:, :, None, None]
    return cw * mfm + (1.0 - cw) * feature_map


if __name__ == "__main__":
    N, C, H, W = 2, 4, 16, 16
    Hm, Wm = 8, 8
    key = jax.random.PRNGKey(0)
    k_fm, k_mask, k_params = jax.random.split(key, 3)

    feature_map = jax.random.normal(k_fm, (N, C, H, W), jnp.float32)
    mask = jax.nn.sigmoid(jax.random.normal(k_mask, (N, 1, Hm, Wm), jnp.float32))
    params = init_params(k_params, C, r=1)

    out = masked_attention(feature_map, mask, params)
    out = jax.block_until_ready(out)

    # Reference sees the same bf16-rounded feature map the kernel consumes;
    # tolerances cover the bf16 output quantization and bf16 MXU operands.
    fm_q = feature_map.astype(jnp.bfloat16).astype(jnp.float32)
    ref = masked_attention_ref(fm_q, mask, params)
    np.testing.assert_allclose(np.asarray(out.astype(jnp.float32)),
                               np.asarray(ref), rtol=2e-2, atol=2e-2)
    print("KERNEL_OK")
</pallas_src>

<mosaic_0001>
module attributes {stable_mosaic.version = 11 : i64} {
  func.func @masked_attention_kernel(%arg0: i32, %arg1: memref<1x4x256xbf16, #tpu.memory_space<vmem>>, %arg2: memref<1x1x64xf32, #tpu.memory_space<vmem>>, %arg3: memref<64x256xf32, #tpu.memory_space<vmem>>, %arg4: memref<4x16xbf16, #tpu.memory_space<vmem>>, %arg5: memref<1x16xf32, #tpu.memory_space<vmem>>, %arg6: memref<4x4xbf16, #tpu.memory_space<vmem>>, %arg7: memref<1x4xf32, #tpu.memory_space<vmem>>, %arg8: memref<1x4x256xbf16, #tpu.memory_space<vmem>>) attributes {dimension_semantics = [#tpu.dimension_semantics<parallel>], iteration_bounds = array<i64: 2>, scalar_prefetch = 0 : i64, scratch_operands = 0 : i64, tpu.core_type = #tpu.core_type<tc>, window_params = [{transform_indices = @transform_0, window_bounds = array<i64: 1, 4, 256>}, {transform_indices = @transform_1, window_bounds = array<i64: 1, 1, 64>}, {pipeline_mode = #tpu.pipeline_mode<synchronous>, transform_indices = @transform_2, window_bounds = array<i64: 64, 256>}, {pipeline_mode = #tpu.pipeline_mode<synchronous>, transform_indices = @transform_3, window_bounds = array<i64: 4, 16>}, {pipeline_mode = #tpu.pipeline_mode<synchronous>, transform_indices = @transform_4, window_bounds = array<i64: 1, 16>}, {pipeline_mode = #tpu.pipeline_mode<synchronous>, transform_indices = @transform_5, window_bounds = array<i64: 4, 4>}, {pipeline_mode = #tpu.pipeline_mode<synchronous>, transform_indices = @transform_6, window_bounds = array<i64: 1, 4>}, {transform_indices = @transform_7, window_bounds = array<i64: 1, 4, 256>}]} {
    %c0 = arith.constant 0 : index
    %c0_0 = arith.constant 0 : index
    %c0_1 = arith.constant 0 : index
    %0 = vector.load %arg1[%c0, %c0_0, %c0_1] : memref<1x4x256xbf16, #tpu.memory_space<vmem>>, vector<1x4x256xbf16>
    %c0_2 = arith.constant 0 : index
    %c0_3 = arith.constant 0 : index
    %c0_4 = arith.constant 0 : index
    %1 = vector.load %arg2[%c0_2, %c0_3, %c0_4] : memref<1x1x64xf32, #tpu.memory_space<vmem>>, vector<1x1x64xf32>
    %2 = vector.shape_cast %1 : vector<1x1x64xf32> to vector<1x64xf32>
    %c0_5 = arith.constant 0 : index
    %c0_6 = arith.constant 0 : index
    %3 = vector.load %arg3[%c0_5, %c0_6] : memref<64x256xf32, #tpu.memory_space<vmem>>, vector<64x256xf32>
    %cst = arith.constant dense<0.000000e+00> : vector<1x256xf32>
    %4 = tpu.matmul %2, %3, %cst {dimension_numbers = #tpu.dot_dimension_numbers<[1], [0], [0], [1], [0, 0, 1, 1], [], []>} : vector<1x64xf32>, vector<64x256xf32>, vector<1x256xf32> -> vector<1x256xf32>
    %5 = arith.truncf %4 : vector<1x256xf32> to vector<1x256xbf16>
    %6 = vector.shape_cast %5 : vector<1x256xbf16> to vector<1x1x256xbf16>
    %7 = vector.broadcast %6 : vector<1x1x256xbf16> to vector<1x4x256xbf16>
    %8 = arith.mulf %0, %7 : vector<1x4x256xbf16>
    %cst_7 = arith.constant 1.000000e+00 : bf16
    %9 = vector.broadcast %cst_7 : bf16 to vector<1x1x256xbf16>
    %cst_8 = arith.constant dense<0xFF80> : vector<1x4xbf16>
    %10 = vector.multi_reduction <maximumf>, %0, %cst_8 [2] : vector<1x4x256xbf16> to vector<1x4xbf16>
    %11 = arith.extf %10 : vector<1x4xbf16> to vector<1x4xf32>
    %cst_9 = arith.constant dense<0xFF80> : vector<1x4xbf16>
    %12 = vector.multi_reduction <maximumf>, %8, %cst_9 [2] : vector<1x4x256xbf16> to vector<1x4xbf16>
    %13 = arith.extf %12 : vector<1x4xbf16> to vector<1x4xf32>
    %14 = vector.shape_cast %5 : vector<1x256xbf16> to vector<1x1x256xbf16>
    %15 = tpu.concatenate %9, %14 in 1 : vector<1x1x256xbf16>, vector<1x1x256xbf16> -> vector<1x2x256xbf16>
    "tpu.trace_start"() <{level = 10 : i32, message = "nch,nkh->nck"}> : () -> ()
    %cst_10 = arith.constant dense<0.000000e+00> : vector<1x4x2xf32>
    %16 = tpu.matmul %0, %15, %cst_10 {dimension_numbers = #tpu.dot_dimension_numbers<[2], [2], [1], [1], [0, 0, 0, 1, 1, 1], [0], [0]>} : vector<1x4x256xbf16>, vector<1x2x256xbf16>, vector<1x4x2xf32> -> vector<1x4x2xf32>
    "tpu.trace_stop"() : () -> ()
    %17 = vector.extract_strided_slice %16 {offsets = [0, 0, 0], sizes = [1, 4, 1], strides = [1, 1, 1]} : vector<1x4x2xf32> to vector<1x4x1xf32>
    %18 = vector.shape_cast %17 : vector<1x4x1xf32> to vector<1x4xf32>
    %cst_11 = arith.constant 3.906250e-03 : f32
    %19 = vector.broadcast %cst_11 : f32 to vector<1x4xf32>
    %20 = arith.mulf %18, %19 : vector<1x4xf32>
    %21 = vector.extract_strided_slice %16 {offsets = [0, 0, 1], sizes = [1, 4, 1], strides = [1, 1, 1]} : vector<1x4x2xf32> to vector<1x4x1xf32>
    %22 = vector.shape_cast %21 : vector<1x4x1xf32> to vector<1x4xf32>
    %cst_12 = arith.constant 3.906250e-03 : f32
    %23 = vector.broadcast %cst_12 : f32 to vector<1x4xf32>
    %24 = arith.mulf %22, %23 : vector<1x4xf32>
    %25 = tpu.concatenate %20, %11, %13, %24 in 0 : vector<1x4xf32>, vector<1x4xf32>, vector<1x4xf32>, vector<1x4xf32> -> vector<4x4xf32>
    %26 = arith.truncf %25 : vector<4x4xf32> to vector<4x4xbf16>
    %c0_13 = arith.constant 0 : index
    %c0_14 = arith.constant 0 : index
    %27 = vector.load %arg4[%c0_13, %c0_14] : memref<4x16xbf16, #tpu.memory_space<vmem>>, vector<4x16xbf16>
    %cst_15 = arith.constant dense<0.000000e+00> : vector<4x16xf32>
    %28 = tpu.matmul %26, %27, %cst_15 {dimension_numbers = #tpu.dot_dimension_numbers<[1], [0], [0], [1], [0, 0, 1, 1], [], []>} : vector<4x4xbf16>, vector<4x16xbf16>, vector<4x16xf32> -> vector<4x16xf32>
    %c0_16 = arith.constant 0 : index
    %c0_17 = arith.constant 0 : index
    %29 = vector.load %arg5[%c0_16, %c0_17] : memref<1x16xf32, #tpu.memory_space<vmem>>, vector<1x16xf32>
    %30 = vector.broadcast %29 : vector<1x16xf32> to vector<4x16xf32>
    %31 = arith.addf %28, %30 : vector<4x16xf32>
    %cst_18 = arith.constant 0.000000e+00 : f32
    %32 = vector.broadcast %cst_18 : f32 to vector<4x16xf32>
    %33 = arith.cmpf ogt, %31, %32 : vector<4x16xf32>
    %cst_19 = arith.constant 2.000000e-01 : f32
    %34 = vector.broadcast %cst_19 : f32 to vector<4x16xf32>
    %35 = arith.mulf %34, %31 : vector<4x16xf32>
    %36 = arith.select %33, %31, %35 : vector<4x16xi1>, vector<4x16xf32>
    %37 = vector.extract_strided_slice %36 {offsets = [0, 0], sizes = [1, 4], strides = [1, 1]} : vector<4x16xf32> to vector<1x4xf32>
    %38 = vector.extract_strided_slice %36 {offsets = [1, 4], sizes = [1, 4], strides = [1, 1]} : vector<4x16xf32> to vector<1x4xf32>
    %39 = arith.addf %37, %38 : vector<1x4xf32>
    %40 = vector.extract_strided_slice %36 {offsets = [2, 8], sizes = [1, 4], strides = [1, 1]} : vector<4x16xf32> to vector<1x4xf32>
    %41 = arith.addf %39, %40 : vector<1x4xf32>
    %42 = vector.extract_strided_slice %36 {offsets = [3, 12], sizes = [1, 4], strides = [1, 1]} : vector<4x16xf32> to vector<1x4xf32>
    %43 = arith.addf %41, %42 : vector<1x4xf32>
    %44 = arith.truncf %43 : vector<1x4xf32> to vector<1x4xbf16>
    %c0_20 = arith.constant 0 : index
    %c0_21 = arith.constant 0 : index
    %45 = vector.load %arg6[%c0_20, %c0_21] : memref<4x4xbf16, #tpu.memory_space<vmem>>, vector<4x4xbf16>
    %cst_22 = arith.constant dense<0.000000e+00> : vector<1x4xf32>
    %46 = tpu.matmul %44, %45, %cst_22 {dimension_numbers = #tpu.dot_dimension_numbers<[1], [0], [0], [1], [0, 0, 1, 1], [], []>} : vector<1x4xbf16>, vector<4x4xbf16>, vector<1x4xf32> -> vector<1x4xf32>
    %c0_23 = arith.constant 0 : index
    %c0_24 = arith.constant 0 : index
    %47 = vector.load %arg7[%c0_23, %c0_24] : memref<1x4xf32, #tpu.memory_space<vmem>>, vector<1x4xf32>
    %48 = arith.addf %46, %47 : vector<1x4xf32>
    %49 = arith.negf %48 : vector<1x4xf32>
    %50 = math.exp %49 : vector<1x4xf32>
    %cst_25 = arith.constant 1.000000e+00 : f32
    %51 = vector.broadcast %cst_25 : f32 to vector<1x4xf32>
    %52 = arith.addf %51, %50 : vector<1x4xf32>
    %53 = arith.divf %51, %52 : vector<1x4xf32>
    %54 = arith.truncf %53 : vector<1x4xf32> to vector<1x4xbf16>
    %55 = vector.shape_cast %54 : vector<1x4xbf16> to vector<1x4x1xbf16>
    %56 = arith.subf %8, %0 : vector<1x4x256xbf16>
    %57 = vector.broadcast %55 : vector<1x4x1xbf16> to vector<1x4x256xbf16>
    %58 = arith.mulf %57, %56 : vector<1x4x256xbf16>
    %59 = arith.addf %0, %58 : vector<1x4x256xbf16>
    %c0_26 = arith.constant 0 : index
    %c0_27 = arith.constant 0 : index
    %c0_28 = arith.constant 0 : index
    %60 = vector.load %arg8[%c0_26, %c0_27, %c0_28] : memref<1x4x256xbf16, #tpu.memory_space<vmem>>, vector<1x4x256xbf16>
    tpu.vector_store %arg8[%c0_26, %c0_27, %c0_28], %59 {strides = array<i32>} : memref<1x4x256xbf16, #tpu.memory_space<vmem>>, vector<1x4x256xbf16>,
    return
  }
  func.func @transform_0(%arg0: i32) -> (i32, i32, i32) {
    %c0_i32 = arith.constant 0 : i32
    %c0_i32_0 = arith.constant 0 : i32
    %c0_i32_1 = arith.constant 0 : i32
    return %arg0, %c0_i32, %c0_i32_0 : i32, i32, i32
  }
  func.func @transform_1(%arg0: i32) -> (i32, i32, i32) {
    %c0_i32 = arith.constant 0 : i32
    %c0_i32_0 = arith.constant 0 : i32
    %c0_i32_1 = arith.constant 0 : i32
    return %arg0, %c0_i32, %c0_i32_0 : i32, i32, i32
  }
  func.func @transform_2(%arg0: i32) -> (i32, i32) {
    %c0_i32 = arith.constant 0 : i32
    %c0_i32_0 = arith.constant 0 : i32
    %c0_i32_1 = arith.constant 0 : i32
    return %c0_i32, %c0_i32_0 : i32, i32
  }
  func.func @transform_3(%arg0: i32) -> (i32, i32) {
    %c0_i32 = arith.constant 0 : i32
    %c0_i32_0 = arith.constant 0 : i32
    %c0_i32_1 = arith.constant 0 : i32
    return %c0_i32, %c0_i32_0 : i32, i32
  }
  func.func @transform_4(%arg0: i32) -> (i32, i32) {
    %c0_i32 = arith.constant 0 : i32
    %c0_i32_0 = arith.constant 0 : i32
    %c0_i32_1 = arith.constant 0 : i32
    return %c0_i32, %c0_i32_0 : i32, i32
  }
  func.func @transform_5(%arg0: i32) -> (i32, i32) {
    %c0_i32 = arith.constant 0 : i32
    %c0_i32_0 = arith.constant 0 : i32
    %c0_i32_1 = arith.constant 0 : i32
    return %c0_i32, %c0_i32_0 : i32, i32
  }
  func.func @transform_6(%arg0: i32) -> (i32, i32) {
    %c0_i32 = arith.constant 0 : i32
    %c0_i32_0 = arith.constant 0 : i32
    %c0_i32_1 = arith.constant 0 : i32
    return %c0_i32, %c0_i32_0 : i32, i32
  }
  func.func @transform_7(%arg0: i32) -> (i32, i32, i32) {
    %c0_i32 = arith.constant 0 : i32
    %c0_i32_0 = arith.constant 0 : i32
    %c0_i32_1 = arith.constant 0 : i32
    return %arg0, %c0_i32, %c0_i32_0 : i32, i32, i32
  }
}

</mosaic_0001>

<bundles_post_ra>
// kernel: tpu_custom_call.1
= control target key start
LH: loop header
LB: loop body
LE: loop exit
PB: predicated region body
PF: predicated region fallthrough
CT: control target
= control target key end

     0   :  { %12 = vsyncpa [#allocation3], 0  ;;  %s1426_s0 = inlined_call_operand.hbm [shape: bf16[2,4,256], index: 0, kind: input, shape index: {}]   ;;  %s1427_s1 = inlined_call_operand.vmem [shape: f32[2,1,64], index: 1, kind: input, shape index: {}]   ;;  %s1428_s2 = inlined_call_operand.hbm [shape: f32[64,256], index: 2, kind: input, shape index: {}]   ;;  %s1429_s3 = inlined_call_operand.vmem [shape: bf16[4,16], index: 3, kind: input, shape index: {}]   ;;  %s1430_s4 = inlined_call_operand.vmem [shape: f32[1,16], index: 4, kind: input, shape index: {}]   ;;  %s1431_s5 = inlined_call_operand.vmem [shape: bf16[4,4], index: 5, kind: input, shape index: {}]   ;;  %s1432_s6 = inlined_call_operand.vmem [shape: f32[1,4], index: 6, kind: input, shape index: {}]   ;;  %s1433_s7 = inlined_call_operand.hbm [shape: bf16[2,4,256], index: 7, kind: output, shape index: {}]  }
   0x1   :  { %14 = vsyncpa [#allocation3 + $0x1], 0 }
   0x2   :  { %15 = vsyncpa [#allocation6], 0 }
   0x3   :  { %16 = vsyncpa [#allocation4], 0 }
   0x4   :  { %18 = vsyncpa [#allocation4 + $0x1], 0  ;;  %s1162_s24 = smov 0   ;;  %s1164_s25 = smov 0  }
   0x5   :  { %s1166_s26 = smov 0   ;;  %s1168_s27 = smov 0  }
   0x6 LB: > { %s1183_s28 = sadd.s32 4294967295, %s1107_s27   ;;  %s850_s29 = sadd.s32 4294967294, %s1107_s27   ;;  %s1107_s27 = sphi %s1168_s27, %s1453_s27   ;;  %s1103_s26 = sphi %s1166_s26, %s1452_s26   ;;  %s1099_s25 = sphi %s1164_s25, %s1451_s25   ;;  %s1095_s24 = sphi %s1162_s24, %s1450_s24  }
   0x7   : > { %p44_p0 = scmp.ne.s32.totalorder %s1099_s25, %s1095_s24  ;;  %p1434_p1 = scmp.eq.s32.totalorder %s1183_s28, 0 }
   0x8   : > { %p205_p3 = scmp.eq.s32.totalorder %s850_s29, 1  ;;  %p851_p5 = scmp.ge.s32.totalorder %s1107_s27, 1 }
   0x9   : > { %p1192_p4 = por %p1434_p1, %p44_p0  ;;  %p212_p7 = scmp.lt.s32.totalorder %s1107_s27, 3 }
   0xa   : > { %p1197_p6 = por %p205_p3, %p44_p0  ;;  %s1109_s10 = smov [#allocation5]  }
   0xb   : > { %s1437_s30 = scalar_select %p1192_p4, 1, 0 }
   0xc   : > { %s1438_s8 = scalar_select %p1197_p6, 1, 0 }
   0xd   : > { %p1202_p8 = pnand %p851_p5, %p212_p7  ;;  %s224_s11 = sshll.u32 %s1109_s10, 4  ;;  %s1206_s11 = int_to_ptr.vmem [resolvable:$true] %s224_s11 }
   0xe   : > { %s1218_s13 = sadd.s32 1, %s1107_s27   ;;  %s31_s14 = sadd.s32 1, %s1103_s26 }
   0xf   : > { %s1439_s9 = scalar_select %p1202_p8, 1, 0 }
  0x10   : > { %p913_p9 = pneg %p1202_p8  ;;  %s28_s15 = ssub.s32 %s1107_s27, %s1218_s13 }
  0x11   : > { %s979_s18 = scalar_lea.hbm %s1428_s2, 2048 }
  0x12   : > { %p1213_p11 = pnand %p913_p9, %p1434_p1  ;;  %p980_p12 = scmp.ne.s32.totalorder %s1428_s2, %s979_s18 }
  0x13   : > { %p986_p5 = scmp.lt.u32.totalorder %s979_s18, %s1428_s2 }
  0x14   : > { %p981_p13 = pneg %p1213_p11 }
  0x16   : > { %p982_p0 = pnand %p981_p13, %p980_p12 }
  0x18   : > { %p983_p3 = pneg %p982_p0 }
  0x1a   : > { %p988_p7 = pnand %p986_p5, %p983_p3 }
  0x1c   : > { %991 = shalt.err (!%p988_p7)
}
  0x1d   : > { %s992_s23 = scalar_lea.vmem %s1206_s11, 2048  ;;  %p1000_p2 = scmp.lt.s32.totalorder %s1206_s11, %s1206_s11 }
  0x1e   : > { %p993_p9 = scmp.ne.s32.totalorder %s1206_s11, %s992_s23  ;;  %p1001_p6 = scmp.lt.s32.totalorder %s992_s23, %s992_s23 }
  0x20   : > { %p995_p10 = pnand %p993_p9, %p981_p13  ;;  %p1002_p4 = por %p1001_p6, %p1000_p2 }
  0x22   : > { %p996_p1 = pneg %p995_p10 }
  0x24   : > { %p1003_p8 = pnand %p1002_p4, %p996_p1 }
  0x26   : > { %1006 = shalt.err (!%p1003_p8)
}
  0x27   : > { %s1110_s29 = smov 256   ;;  %s1111_s10 = smov 16  }
  0x28   : > { %916 = dma.hbm_to_vmem [thread:$0]  (!%p1213_p11), %s1428_s2, 2048, %s1206_s11, [#allocation6], %s1110_s29, %s1110_s29, %s1111_s10  }
  0x29   : > { %p29_p2 = scmp.eq.s32.totalorder %s28_s15, 0  ;;  %p38_p1 = scmp.ne.s32.totalorder %s1103_s26, %s1099_s25 }
  0x2a   : > { %p39_p4 = scmp.eq.s32.totalorder %s1107_s27, 0  ;;  %p926_p6 = scmp.lt.s32.totalorder %s1107_s27, 2 }
  0x2b   : > { %s1249_s18 = scalar_select %p29_p2, %s1103_s26, %s31_s14  }
  0x2c   : > { %p40_p8 = por %p39_p4, %p38_p1  ;;  %p1441_p10 = scmp.eq.s32.totalorder %s1183_s28, 1 }
  0x2d   : > { %s250_s20 = sand.u32 1, %s1103_s26   ;;  %s871_s21 = sshll.u32 %s1107_s27, 6 }
  0x2e   : > { %p1253_p12 = por %p1441_p10, %p38_p1  ;;  %s854_s22 = sshll.u32 %s250_s20, 2 }
  0x2f   : > { %s1262_s16 = scalar_lea.hbm %s1426_s0, %s871_s21  ;;  %s254_s11 = scalar_lea.vmem [#allocation2], %s854_s22 }
  0x30   : > { %s262_s14 = sshll.u32 %s254_s11, 4  ;;  %p1264_p11 = pnand %p926_p6, %p40_p8  ;;  %s1268_s14 = int_to_ptr.vmem [resolvable:$true] %s262_s14 }
  0x31   : > { %s251_s29 = scalar_lea.sflag [#allocation3], %s250_s20  ;;  %s1007_s10 = scalar_lea.hbm %s1262_s16, 64 }
  0x32   : > { %p1008_p13 = scmp.ne.s32.totalorder %s1262_s16, %s1007_s10  ;;  %p1009_p0 = pneg %p1264_p11 }
  0x33   : > { %s1012_s22 = scalar_lea.hbm %s1426_s0, 128  ;;  %p1013_p7 = scmp.lt.u32.totalorder %s1262_s16, %s1426_s0 }
  0x34   : > { %p1010_p3 = pnand %p1009_p0, %p1008_p13  ;;  %p1014_p9 = scmp.lt.u32.totalorder %s1012_s22, %s1007_s10 }
  0x35   : > { %p1016_p1 = scmp.lt.u32.totalorder %s1007_s10, %s1262_s16 }
  0x36   : > { %p1011_p5 = pneg %p1010_p3  ;;  %p1015_p2 = por %p1014_p9, %p1013_p7 }
  0x38   : > { %p1017_p4 = por %p1016_p1, %p1015_p2 }
  0x3a   : > { %p1018_p6 = pnand %p1017_p4, %p1011_p5 }
  0x3c   : > { %1021 = shalt.err (!%p1018_p6)
}
  0x3d   : > { %s1022_s20 = scalar_lea.vmem %s1268_s14, 64  ;;  %s1112_s11 = smov [#allocation2]  }
  0x3e   : > { %p1023_p8 = scmp.ne.s32.totalorder %s1268_s14, %s1022_s20  ;;  %s1027_s17 = sshll.u32 %s1112_s11, 4  ;;  %s1028_s17 = int_to_ptr.vmem [resolvable:$false] %s1027_s17 }
  0x3f   : > { %s1029_s21 = scalar_lea.vmem %s1028_s17, 128  ;;  %p1030_p3 = scmp.lt.s32.totalorder %s1268_s14, %s1028_s17 }
  0x40   : > { %p1025_p10 = pnand %p1023_p8, %p1009_p0  ;;  %p1031_p7 = scmp.lt.s32.totalorder %s1029_s21, %s1022_s20 }
  0x42   : > { %p1026_p13 = pneg %p1025_p10  ;;  %p1032_p9 = por %p1031_p7, %p1030_p3 }
  0x44   : > { %p1033_p2 = pnand %p1032_p9, %p1026_p13 }
  0x46   : > { %1036 = shalt.err (!%p1033_p2)
}
  0x47   : > { %920 = dma.hbm_to_vmem [thread:$0]  (!%p1264_p11), %s1262_s16, 64, %s1268_s14, %s251_s29  }
  0x48   : > { %p1444_p5 = scmp.ne.s32.totalorder %s1439_s9, 0 }
  0x49   : > { %s1298_s10 = sand.u32 (!%p1444_p5), 1, %s1099_s25   ;;  %p1445_p0 = scmp.ne.s32.totalorder (!%p1444_p5), %s1437_s30, 0 }
  0x4a   : > { %277 = sbr.rel (%p1444_p5) target bundleno = 1407 (0x57f), region = 48  ;;  %s858_s22 = sshll.u32 (!%p1444_p5), %s1298_s10, 2 }
  0x4b   : > { %s280_s12 = scalar_lea.sflag (!%p1444_p5), [#allocation3], %s1298_s10  ;;  %s1304_s23 = scalar_lea.vmem (!%p1444_p5), [#allocation2], %s858_s22 }
  0x51   : > { %1082 = dma.done.wait (%p1445_p0), %s280_s12, 64  }
  0x52   : > { %1084 = vsyncadd (%p1445_p0), %s280_s12, 4294967232  ;;  %p1446_p11 = scmp.eq.s32.totalorder %s1183_s28, 0 }
  0x54   : > { %1086 = dma.done.wait (%p1446_p11), [#allocation6], 2048   ;;  %p1447_p1 = pmov %p1446_p11 }
  0x55   : > { %v1113_v0 = vmov 0.0   ;;  %v330_v1 = vld [vmem:[#allocation5 + $0x8] sm:$0xff]  ;;  %v332_v2 = vld [vmem:[#allocation5 + $0x18] sm:$0xff]  ;;  %v329_v3 = vld [vmem:[#allocation5] sm:$0xff]  ;;  %p321_p4 = scmp.lt.s32.totalorder %s1183_s28, 1  ;;  %vm345_vm0 = vcmask 523264   ;;  %v425_v26 = vlaneseq }
  0x56   : > { %1088 = vsyncadd (%p1447_p1), [#allocation6], 4294965248  ;;  %413 = vmatprep.mubr.f32.mxu0 %v1113_v0  ;;  %v889_v4 = vpack.c.bf16 %v332_v2, %v330_v1  ;;  %v331_v5 = vld [vmem:[#allocation5 + $0x10] sm:$0xff]  ;;  %v334_v6 = vld [vmem:[#allocation5 + $0x28] sm:$0xff]  ;;  %v1114_v27 = vmov 1983009808  }
  0x57   : > { %v336_v7 = vld [vmem:[#allocation5 + $0x38] sm:$0xff]  ;;  %v891_v8 = vpack.c.bf16 %v331_v5, %v329_v3  ;;  %v333_v10 = vld [vmem:[#allocation5 + $0x20] sm:$0xff]  ;;  %v335_v11 = vld [vmem:[#allocation5 + $0x30] sm:$0xff]  ;;  %s322_s30 = scalar_select %p321_p4, %s1183_s28, 1  ;;  %v440_v28 = vunpack.c.l.s4 %v1114_v27  ;;  %v426_v29 = vshrl.u32 %v425_v26, 7  ;;  %vm457_vm1 = vcmask 1041408  }
  0x58   : > { %v893_v9 = vpack.c.bf16 %v336_v7, %v334_v6  ;;  %v338_v12 = vld [vmem:[#allocation5 + $0x48] sm:$0xff]  ;;  %890 = vmatprep.subr.bf16.mxu0 %v889_v4  ;;  %v340_v13 = vld [vmem:[#allocation5 + $0x58] sm:$0xff]  ;;  %v895_v14 = vpack.c.bf16 %v335_v11, %v333_v10  ;;  %v337_v16 = vld [vmem:[#allocation5 + $0x40] sm:$0xff]  ;;  %v547_v38 = vand.u32 127, %v425_v26  ;;  %vm494_vm2 = vcmask 1040384   ;;  %s1118_s12 = smov 120  }
  0x59   : > { %892 = vmatpush1.bf16.msra.mxu0 %v891_v8  ;;  %v897_v15 = vpack.c.bf16 %v340_v13, %v338_v12  ;;  %v339_v17 = vld [vmem:[#allocation5 + $0x50] sm:$0xff]  ;;  %v342_v18 = vld [vmem:[#allocation5 + $0x68] sm:$0xff]  ;;  %v344_v19 = vld [vmem:[#allocation5 + $0x78] sm:$0xff]  ;;  %s323_s14 = scalar_lea.vmem %s1427_s1, %s322_s30  ;;  %v441_v30 = vunpack.c.0.s8 %v440_v28  ;;  %vm495_vm3 = vsmask.f32 256  ;;  %v1332_v42 = vsub.s32 0, %v426_v29 }
  0x5a   : > { %894 = vmatprep.subr.bf16.mxu0 %v893_v9  ;;  %v899_v20 = vpack.c.bf16 %v339_v17, %v337_v16  ;;  %v901_v21 = vpack.c.bf16 %v344_v19, %v342_v18  ;;  %v341_v22 = vld [vmem:[#allocation5 + $0x60] sm:$0xff]  ;;  %v343_v23 = vld [vmem:[#allocation5 + $0x70] sm:$0xff]  ;;  %v328_v25 = vld [vmem:[%s323_s14] sm:$0x1]  ;;  %v1330_v39 = vsub.s32 %v547_v38, %v426_v29  ;;  %v1115_v61 = vmov 0   ;;  %s1120_s30 = smov 116  }
  0x5b   : > { %v903_v24 = vpack.c.bf16 %v343_v23, %v341_v22  ;;  %v1321_v31 = vsub.s32 %v441_v30, %v426_v29  ;;  %v1324_v32 = vld [vmem:[%s1304_s23] sm:$0xf]  ;;  %vm496_vm4 = vmand %vm494_vm2, %vm495_vm3  ;;  %972 = vset.pattern.permute.xlu1 %v1115_v61  ;;  %v1116_v62 = vmov 1   ;;  %vm1117_vm5 = vmmov 0   ;;  %s1119_s23 = smov 124   ;;  %s872_s14 = sshll.u32 %s1183_s28, 6 }
  0x5c   : > { %974 = vset.pattern.permute.xlu0 %v1116_v62  ;;  %v579_v5 = vld [vmem:[%s1429_s3] sm:$0x3]  ;;  %vm576_vm6 = vcmask 1042432   ;;  %vm587_vm7 = vcmask 31744   ;;  %s320_s15 = scalar_lea.vmem [#allocation7], %s858_s22  ;;  %s1382_s17 = scalar_lea.hbm %s1433_s7, %s872_s14 }
  0x5d   : > { %896 = vmatpush1.bf16.msra.mxu0 %v895_v14  ;;  %v455_v33 = vrot.slane %v1324_v32, %v1321_v31  ;;  %v592_v6 = vsel %vm457_vm1, %v579_v5, 0  ;;  %s761_s29 = sshll.u32 %s320_s15, 4  ;;  %s747_s21 = scalar_lea.sflag [#allocation4], %s1298_s10  ;;  %s1384_s29 = int_to_ptr.vmem [resolvable:$true] %s761_s29 }
  0x5e   : > { %898 = vmatprep.subr.bf16.mxu0 %v897_v15  ;;  %s1037_s28 = scalar_lea.vmem %s1384_s29, 64  ;;  %s1121_s22 = smov [#allocation7]  }
  0x5f   : > { %v456_v34 = vcombine.high %v455_v33, %v455_v33  ;;  %v460_v35 = vsel %vm457_vm1, %v455_v33, 4286644096  ;;  %p1038_p6 = scmp.ne.s32.totalorder %s1384_s29, %s1037_s28 }
  0x61   : > { %900 = vmatpush1.bf16.msra.mxu0 %v899_v20  ;;  %v463_v36 = vsel %vm457_vm1, %v456_v34, 4286644096  ;;  %533 = vmatprep.mubr.bf16.mxu1 %v456_v34  ;;  %v862_v20 = vld [vmem:[%s1430_s4] ss:$0 sm:$0xff]  ;;  %p1039_p8 = pnand %p1038_p6, %p1253_p12 }
  0x62   : > { %902 = vmatprep.subr.bf16.mxu0 %v901_v21  ;;  %v465_v37 = vmax.bf16 %v463_v36, %v460_v35  ;;  %v654_v21 = vld [vmem:[%s1431_s5] sm:$0x3] }
  0x63   : > { %v660_v22 = vsel %vm457_vm1, %v654_v21, 0  ;;  %p1040_p10 = pneg %p1039_p8 }
  0x64   : > { %466 = vmax.xlane.bf16.xlu0 %v465_v37 }
  0x65   : > { %904 = vmatpush1.bf16.msra.mxu0 %v903_v24 }
  0x66   : > { %883 = vmatprep.subr.bf16.mxu0 %v1113_v0 }
  0x68   : > { %861 = vmatmul.mubr.msk.f32.vlgmr.msra.gmra.mrb[0].mxu0 %vm345_vm0, %v328_v25 }
  0x69   : > { %885 = vmatprep.mubr.msk.bf16.mxu0 %vm1117_vm5, %v1113_v0  ;;  %884 = vmatpush3.bf16.msra.mxu0 %v660_v22 }
  0xf5   : > { %v467_v7 = vpop.xlane.xlu0 %466 }
  0xf6   : > { %v468_v8 = vunpack.c.l.bf16 %v467_v7 }
  0xf8   : > { %v557_v13 = vrot.slane %v468_v8, %v1330_v39 }
 0x13b   : > { %v415_v40 = vpop.f32.mrb[0].mxu0 }
 0x13c   : > { %v420_v41 = vpack.c.bf16 %v415_v40, %v415_v40  ;;  %v417_v43 = vpop.f32.mrb[1].mxu0 }
 0x13d   : > { %v421_v44 = vpack.c.bf16 %v417_v43, %v417_v43  ;;  %v655_v43 = vld [vmem:[%s1432_s6] sm:$0x1] }
 0x13e   : > { %v423_v45 = vpack.i.b16 %v420_v41, %v420_v41  ;;  %v488_v46 = vshll.u32 %v420_v41, 16 }
 0x13f   : > { %v430_v47 = vpack.i.b16 %v421_v44, %v421_v44  ;;  %v490_v48 = vshll.u32 %v421_v44, 16 }
 0x140   : > { %v428_v49 = vrot.slane %v423_v45, %v1332_v42  ;;  %v497_v52 = vsel %vm496_vm4, 1065369472, %v488_v46 }
 0x141   : > { %v435_v50 = vrot.slane %v430_v47, %v1332_v42  ;;  %v498_v51 = vsel %vm496_vm4, 1065369472, %v490_v48 }
 0x142   : > { %501 = vmatprep.subr.bf16.mxu1 %v498_v51 }
 0x143   : > { %v438_v53 = vcombine.low %v428_v49, %v435_v50  ;;  %502 = vmatpush1.bf16.xpose.msra.mxu1 %v497_v52 }
 0x144   : > { %877 = vmatprep.subr.bf16.mxu1 %v1113_v0 }
 0x145   : > { %v445_v54 = vrot.slane %v438_v53, %v1321_v31 }
 0x147   : > { %v1340_v55 = vmul.bf16 %v445_v54, %v1324_v32 }
 0x149   : > { %v476_v56 = vrot.slane %v1340_v55, %v1321_v31 }
 0x14a   : > { %534 = vmatmul.mubr.bf16.vlgmr.msra.gmra.mrb[0].mxu1 %v455_v33 }
 0x14b   : > { %v477_v57 = vcombine.high %v476_v56, %v476_v56  ;;  %v479_v58 = vsel %vm457_vm1, %v476_v56, 4286644096  ;;  %878 = vmatpush3.bf16.msra.mxu1 %v592_v6  ;;  %879 = vmatprep.mubr.msk.bf16.mxu1 %vm1117_vm5, %v1113_v0 }
 0x14d   : > { %v482_v59 = vsel %vm457_vm1, %v477_v57, 4286644096  ;;  %v719_v57 = vsub.bf16 %v1340_v55, %v1324_v32 }
 0x14e   : > { %v484_v60 = vmax.bf16 %v482_v59, %v479_v58 }
 0x14f   : > { %v727_v58 = vrot.slane %v719_v57, %v1321_v31 }
 0x150   : > { %485 = vmax.xlane.bf16.xlu0 %v484_v60 }
 0x151   : > { %v728_v59 = vcombine.high %v727_v58, %v727_v58 }
 0x1e1   : > { %v486_v9 = vpop.xlane.xlu0 %485 }
 0x1e2   : > { %v487_v11 = vunpack.c.l.bf16 %v486_v9 }
 0x1e4   : > { %v563_v15 = vrot.slane %v487_v11, %v1330_v39 }
 0x21d   : > { %v535_v63 = vpop.f32.mrb[0].mxu1 }
 0x21e   : > { %v541_v1 = vmul.f32 0.00390625, %v535_v63  ;;  %v537_v2 = vpop.f32.mrb[1].mxu1 }
 0x21f   : > { %v538_v3 = vpop.f32.mrb[2].mxu1 }
 0x220   : > { %544 = vperm.xlu1 %972, %v541_v1   ;;  %v539_v4 = vpop.f32.mrb[3].mxu1 }
 0x224   : > { %973 = vset.pattern.permute.xlu1 %v1116_v62 }
 0x225   : > { %566 = vperm.xlu1 %973, %v541_v1  }
 0x29f   : > { %v545_v10 = vpop.permute.xlu1 %544 }
 0x2a0   : > { %v551_v12 = vrot.slane %v545_v10, %v1330_v39 }
 0x2a2   : > { %v574_v14 = vsel %vm494_vm2, %v551_v12, %v557_v13 }
 0x2a3   : > { %v575_v18 = vsel %vm457_vm1, %v574_v14, %v563_v15 }
 0x2a4   : > { %v567_v16 = vpop.permute.xlu1 %566 }
 0x2a5   : > { %v571_v17 = vrot.slane %v567_v16, %v1330_v39 }
 0x2a7   : > { %v577_v0 = vsel %vm576_vm6, %v575_v18, %v571_v17 }
 0x2a8   : > { %v578_v19 = vpack.c.bf16 %v577_v0, %v577_v0 }
 0x2aa   : > { %880 = vmatmul.mubr.msk.bf16.vlgmr.msra.gmra.mrb[4].mxu1 %vm587_vm7, %v578_v19 }
 0x37d   : > { %v628_v23 = vpop.f32.mrb[4].mxu1 }
 0x37e   : > { %v629_v24 = vadd.f32 %v862_v20, %v628_v23  ;;  %v881_v25 = vpop.f32.mrb[5].mxu1 }
 0x37f   : > { %v631_v26 = vpop.f32.mrb[6].mxu1 }
 0x380   : > { %vm634_vm8 = vcmp.gt.f32.partialorder %v629_v24, 0.0  ;;  %v635_v27 = vmul.f32 0.2, %v629_v24  ;;  %v882_v28 = vpop.f32.mrb[7].mxu1 }
 0x382   : > { %v636_v29 = vsel %vm634_vm8, %v629_v24, %v635_v27 }
 0x383   : > { %v643_v30 = vrot.slane %v636_v29, 2  ;;  %v638_v33 = vrot.slane %v636_v29, 1  ;;  %v648_v34 = vrot.slane %v636_v29, 3 }
 0x385   : > { %644 = vrot.lane.b32.xlu0 %v643_v30, %s1118_s12  ;;  %639 = vrot.lane.b32.xlu1 %v638_v33, %s1119_s23  ;;  %s1041_s12 = sshll.u32 %s1121_s22, 4  ;;  %s1042_s12 = int_to_ptr.vmem [resolvable:$false] %s1041_s12 }
 0x386   : > { %s1043_s23 = scalar_lea.vmem %s1042_s12, 128  ;;  %p1044_p13 = scmp.lt.s32.totalorder %s1384_s29, %s1042_s12 }
 0x387   : > { %p1045_p3 = scmp.lt.s32.totalorder %s1043_s23, %s1037_s28 }
 0x389   : > { %649 = vrot.lane.b32.xlu1 %v648_v34, %s1120_s30  ;;  %p1046_p7 = por %p1045_p3, %p1044_p13 }
 0x38b   : > { %p1047_p9 = pnand %p1046_p7, %p1040_p10 }
 0x3f7   : > { %v640_v35 = vpop.permute.xlu1 %639  ;;  %v645_v37 = vpop.permute.xlu0 %644 }
 0x3f8   : > { %v642_v36 = vadd.f32 %v640_v35, %v636_v29 }
 0x3fa   : > { %v647_v38 = vadd.f32 %v645_v37, %v642_v36 }
 0x3fb   : > { %v650_v39 = vpop.permute.xlu1 %649 }
 0x3fc   : > { %v652_v40 = vadd.f32 %v650_v39, %v647_v38 }
 0x3fe   : > { %v653_v41 = vpack.c.bf16 %v652_v40, %v652_v40 }
 0x400   : > { %886 = vmatmul.mubr.msk.bf16.vlgmr.msra.gmra.mrb[4].mxu0 %vm587_vm7, %v653_v41 }
 0x4d3   : > { %v696_v44 = vpop.f32.mrb[4].mxu0 }
 0x4d4   : > { %v697_v45 = vadd.f32 %v696_v44, %v655_v43  ;;  %v887_v46 = vpop.f32.mrb[5].mxu0 }
 0x4d5   : > { %v699_v47 = vpop.f32.mrb[6].mxu0 }
 0x4d6   : > { %v865_v48 = vmul.f32 -1.442695, %v697_v45  ;;  %v888_v49 = vpop.f32.mrb[7].mxu0 }
 0x4d8   : > { %975 = vpow2.f32 %v865_v48 }
 0x4e2   : > { %v976_v50 = vpop.eup %975 }
 0x4e3   : > { %v705_v51 = vadd.f32 1.0, %v976_v50 }
 0x4e5   : > { %977 = vrcp.f32 %v705_v51 }
 0x4ef   : > { %v978_v52 = vpop.eup %977 }
 0x4f0   : > { %v708_v53 = vpack.c.bf16 %v978_v52, %v978_v52 }
 0x4f2   : > { %v710_v54 = vpack.i.b16 %v708_v53, %v708_v53 }
 0x4f4   : > { %v715_v56 = vrot.slane %v710_v54, %v1332_v42 }
 0x4f6   : > { %717 = vbcast.lane.c.b16.xlu1 %v715_v56, 256 }
 0x568   : > { %v718_v60 = vpop.permute.xlu1 %717 }
 0x569   : > { %v731_v61 = vmul.bf16 %v727_v58, %v718_v60  ;;  %v732_v62 = vmul.bf16 %v728_v59, %v718_v60 }
 0x56b   : > { %v735_v63 = vcombine.low %v731_v61, %v732_v62 }
 0x56d   : > { %v742_v1 = vrot.slane %v735_v63, %v1321_v31 }
 0x56f   : > { %v744_v42 = vadd.bf16 %v742_v1, %v1324_v32 }
 0x571   : > { %745 = vst [vmem:[%s320_s15] sm:$0xf] %v744_v42 }
 0x572   : > { %1050 = shalt.err (!%p1047_p9)
}
 0x573   : > { %s1051_s10 = scalar_lea.hbm %s1382_s17, 64  ;;  %s1055_s16 = scalar_lea.hbm %s1433_s7, 128 }
 0x574   : > { %p1052_p2 = scmp.ne.s32.totalorder %s1382_s17, %s1051_s10  ;;  %p1056_p11 = scmp.lt.u32.totalorder %s1382_s17, %s1433_s7 }
 0x575   : > { %p1057_p1 = scmp.lt.u32.totalorder %s1055_s16, %s1051_s10  ;;  %p1059_p6 = scmp.lt.u32.totalorder %s1051_s10, %s1382_s17 }
 0x576   : > { %p1053_p5 = pnand %p1052_p2, %p1253_p12 }
 0x577   : > { %p1058_p4 = por %p1057_p1, %p1056_p11 }
 0x578   : > { %p1054_p0 = pneg %p1053_p5 }
 0x579   : > { %p1060_p8 = por %p1059_p6, %p1058_p4 }
 0x57b   : > { %p1061_p10 = pnand %p1060_p8, %p1054_p0 }
 0x57d   : > { %1064 = shalt.err (!%p1061_p10)
}
 0x57e   : > { %911 = dma.vmem_to_hbm [thread:$0]  (%p1253_p12), %s1384_s29, 64, %s1382_s17, %s747_s21  }
 0x57f PF: > { %s773_s20 = sand.u32 1, %s1095_s24   ;;  %p1448_p13 = scmp.ne.s32.totalorder %s1438_s8, 0 }
 0x580   : > { %p1449_p3 = scmp.ge.s32.totalorder %s1107_s27, 2  ;;  %s774_s11 = scalar_lea.sflag [#allocation4], %s773_s20 }
 0x582   : > { %p922_p7 = pnand %p1449_p3, %p1448_p13 }
 0x584   : > { %1090 = dma.done.wait (!%p922_p7), %s774_s11, 64  }
 0x585   : > { %1092 = vsyncadd (!%p922_p7), %s774_s11, 4294967232  ;;  %p21_p9 = scmp.ge.s32.totalorder %s1218_s13, 4   ;;  %s1450_s24 = smov %s1099_s25 }
 0x586   : > { %s1451_s25 = smov %s1103_s26  ;;  %s1452_s26 = smov %s1249_s18 }
 0x587   : > { %s1453_s27 = smov %s1218_s13  ;;  %23 = sbr.rel (!%p21_p9) target bundleno = 6 (0x6), region = 100 }
 0x58e   :  { %779 = vsyncpa [#allocation3], 1 }
 0x58f   :  { %781 = vsyncpa [#allocation3 + $0x1], 1 }
 0x590   :  { %782 = vsyncpa [#allocation6], 1 }
 0x591   :  { %783 = vsyncpa [#allocation4], 1 }
 0x592   :  { %785 = vsyncpa [#allocation4 + $0x1], 1 }

</bundles_post_ra>
